<compile_context>
chip_gen: v5e
topology: v5e:2x2
jax: 0.10.0
libtpu: 0.0.40
codegen_flags: <defaults>
</compile_context>

<pallas_src>
import jax
import jax.numpy as jnp
from jax.experimental import pallas as pl
from jax.experimental.pallas import tpu as pltpu


_LANE = 128                                # TPU vreg lane width
_COL_CHOICES = (1024, 512, 256, 128)       # lane-dense column widths (mult. of 128)
_PAD_COLS = 512                            # column width used on the padded path
_TARGET_BLOCK_BYTES = 8 * 1024 * 1024      # ~8 MiB/block: <5% step overhead on all gens
_VMEM_LIMIT_BYTES = 40 * 1024 * 1024       # 2 in + 2 out x 8 MiB buffers + headroom
_SPLIT_MIN_BYTES = 1 * 1024 * 1024         # only split single-block copies above this


def identity_forward(x):
    """Faithful nn.Identity: zero-cost pass-through (no pallas_call, no HBM traffic)."""
    return x


def _identity_copy_kernel(x_ref, o_ref):
    # Pure vld/vst memcpy on the current VMEM tile.
    o_ref[...] = x_ref[...]


def _pick_cols(m):
    """Choose a lane-dense column count for a flat buffer of m words.

    Returns (cols, pad) where `pad` words of padding make m + pad divisible by cols.
    """
    for c in _COL_CHOICES:
        if m % c == 0:
            return c, 0
    # No 128-multiple divides m: pad up to a multiple of _PAD_COLS so the tiled,
    # pipelined path still applies; the tail is sliced off after the kernel.
    padded = pl.cdiv(m, _PAD_COLS) * _PAD_COLS
    return _PAD_COLS, padded - m


def _pick_block_rows(rows, cols, word_bytes):
    """Byte-based block sizing: ~8 MiB per block, rows a multiple of 8 (or full extent)."""
    target = max(8, (_TARGET_BLOCK_BYTES // (cols * word_bytes)) // 8 * 8)
    if rows > target:
        return target
    # Whole tensor fits in one block. For non-trivial sizes, split it in two so
    # both of v7x's TensorCores get work (harmless on single-TC v5e/v6e).
    if rows > 8 and rows * cols * word_bytes >= _SPLIT_MIN_BYTES:
        half = ((rows + 1) // 2 + 7) // 8 * 8
        if half < rows:
            return half
    return rows   # full extent on the row axis


def identity_copy_pallas(x, *, donate_input=False):
    """Explicit materialized copy of `x` via a tiled, pipelined Pallas memcpy.

    With donate_input=True there is nothing useful for the kernel to do: an
    aliased identity copy still DMAs the full array HBM->VMEM->HBM, so we skip
    the pallas_call entirely and return x (which is also the module semantics).
    """
    if donate_input or x.size == 0:
        return x

    orig_shape, orig_dtype = x.shape, x.dtype
    n = x.size
    itemsize = jnp.dtype(orig_dtype).itemsize

    flat = x.reshape(-1)

    # Pack sub-32-bit dtypes (bf16 / int8 / fp8) into uint32 words so the kernel
    # always runs with full (8, 128) lane density per 32-bit vreg element.
    pack = 1
    if (itemsize < 4
            and jnp.dtype(orig_dtype) != jnp.dtype(jnp.bool_)
            and (n * itemsize) % 4 == 0):
        pack = 4 // itemsize
        flat = jax.lax.bitcast_convert_type(flat.reshape(n // pack, pack), jnp.uint32)

    word_dtype = flat.dtype
    word_bytes = jnp.dtype(word_dtype).itemsize
    m = flat.shape[0]

    cols, pad = _pick_cols(m)
    if pad:
        # Only hit for non-128-divisible sizes; keeps the tiled pipeline instead
        # of a single whole-array block.
        flat = jnp.pad(flat, (0, pad))
    rows = (m + pad) // cols

    block_rows = _pick_block_rows(rows, cols, word_bytes)
    grid = (pl.cdiv(rows, block_rows),)

    w2 = flat.reshape(rows, cols)

    out2 = pl.pallas_call(
        _identity_copy_kernel,
        out_shape=jax.ShapeDtypeStruct((rows, cols), word_dtype),
        grid_spec=pl.GridSpec(
            grid=grid,
            in_specs=[pl.BlockSpec((block_rows, cols), lambda i: (i, 0))],
            out_specs=pl.BlockSpec((block_rows, cols), lambda i: (i, 0)),
        ),
        compiler_params=pltpu.CompilerParams(
            # Single row axis; "parallel" lets v7x shard the copy across its two
            # TensorCores (no effect on v5e/v6e).
            dimension_semantics=("parallel",),
            # 2 in + 2 out double-buffers of <=8 MiB blocks, plus headroom.
            # Explicit so v5e's 16 MiB scoped default is not silently tripped;
            # still well under v7x's 64 MiB physical VMEM.
            vmem_limit_bytes=_VMEM_LIMIT_BYTES,
        ),
        # Bandwidth-only op: tell XLA's scheduler there is no compute to hide.
        cost_estimate=pl.CostEstimate(
            flops=0,
            transcendentals=0,
            bytes_accessed=2 * rows * cols * word_bytes,
        ),
    )(w2)

    flat_out = out2.reshape(-1)
    if pad:
        flat_out = flat_out[:m]
    if pack > 1:
        flat_out = jax.lax.bitcast_convert_type(flat_out, orig_dtype).reshape(-1)
    return flat_out.reshape(orig_shape)


if __name__ == "__main__":
    key = jax.random.PRNGKey(0)
    k1, k2, k3 = jax.random.split(key, 3)

    # Small NCHW input consistent with typical conv-model usage in the spec.
    x = jax.random.normal(k1, (2, 4, 16, 16), dtype=jnp.float32)

    # 1) The module's forward is a pure pass-through: zero-cost no-op.
    assert identity_forward(x) is x, "identity_forward must be a pass-through"

    # 2) Explicit Pallas memcpy kernel (f32, 128-divisible path).
    y = jax.block_until_ready(identity_copy_pallas(x))
    assert y.shape == x.shape and y.dtype == x.dtype
    assert bool(jnp.array_equal(y, x)), "identity copy differs from input (f32)"

    # 3) Sub-32-bit dtype: packed-to-uint32 path (bf16).
    xb = jax.random.normal(k2, (2, 4, 16, 16), dtype=jnp.bfloat16)
    yb = jax.block_until_ready(identity_copy_pallas(xb))
    assert yb.shape == xb.shape and yb.dtype == xb.dtype
    assert bool(jnp.array_equal(yb, xb)), "identity copy differs from input (bf16)"

    # 4) Non-128-divisible element count: padded tiled path.
    xo = jax.random.normal(k3, (3, 5, 7), dtype=jnp.float32)
    yo = jax.block_until_ready(identity_copy_pallas(xo))
    assert yo.shape == xo.shape and yo.dtype == xo.dtype
    assert bool(jnp.array_equal(yo, xo)), "identity copy differs from input (odd size)"

    # 5) donate_input short-circuits: an aliased identity copy is pure wasted bandwidth.
    assert identity_copy_pallas(x, donate_input=True) is x

    print("KERNEL_OK")
</pallas_src>

<mosaic_0001>
module attributes {stable_mosaic.version = 11 : i64} {
  func.func @_identity_copy_kernel(%arg0: i32, %arg1: memref<2x1024xf32, #tpu.memory_space<vmem>>, %arg2: memref<2x1024xf32, #tpu.memory_space<vmem>>) attributes {dimension_semantics = [#tpu.dimension_semantics<parallel>], iteration_bounds = array<i64: 1>, scalar_prefetch = 0 : i64, scratch_operands = 0 : i64, tpu.core_type = #tpu.core_type<tc>, window_params = [{transform_indices = @transform_0, window_bounds = array<i64: 2, 1024>}, {transform_indices = @transform_1, window_bounds = array<i64: 2, 1024>}]} {
    %c0 = arith.constant 0 : index
    %c0_0 = arith.constant 0 : index
    %0 = vector.load %arg1[%c0, %c0_0] : memref<2x1024xf32, #tpu.memory_space<vmem>>, vector<2x1024xf32>
    %c0_1 = arith.constant 0 : index
    %c0_2 = arith.constant 0 : index
    %1 = vector.load %arg2[%c0_1, %c0_2] : memref<2x1024xf32, #tpu.memory_space<vmem>>, vector<2x1024xf32>
    tpu.vector_store %arg2[%c0_1, %c0_2], %0 {strides = array<i32>} : memref<2x1024xf32, #tpu.memory_space<vmem>>, vector<2x1024xf32>,
    return
  }
  func.func @transform_0(%arg0: i32) -> (i32, i32) {
    %c0_i32 = arith.constant 0 : i32
    %c0_i32_0 = arith.constant 0 : i32
    return %arg0, %c0_i32 : i32, i32
  }
  func.func @transform_1(%arg0: i32) -> (i32, i32) {
    %c0_i32 = arith.constant 0 : i32
    %c0_i32_0 = arith.constant 0 : i32
    return %arg0, %c0_i32 : i32, i32
  }
}

</mosaic_0001>

<bundles_post_ra>
// kernel: tpu_custom_call.1
= control target key start
LH: loop header
LB: loop body
LE: loop exit
PB: predicated region body
PF: predicated region fallthrough
CT: control target
= control target key end

     0   :  { %6 = vsyncpa [#allocation3], 0  ;;  %s116_s0 = inlined_call_operand.hbm [shape: f32[2,1024], index: 0, kind: input, shape index: {}]   ;;  %s117_s1 = inlined_call_operand.hbm [shape: f32[2,1024], index: 1, kind: output, shape index: {}]  }
   0x1   :  { %7 = vsyncpa [#allocation4], 0  ;;  %s13_s8 = sshll.u32 %s116_s0, 4  ;;  %s98_s9 = smov [#allocation2]   ;;  %s14_s8 = int_to_ptr.hbm [resolvable:$true] %s13_s8 }
   0x2   :  { %s15_s10 = sshll.u32 %s98_s9, 4  ;;  %s16_s10 = int_to_ptr.vmem [resolvable:$true] %s15_s10 }
   0x3   :  { %18 = dma.hbm_to_vmem [thread:$0]  %s14_s8, 256, %s16_s10, [#allocation3]  }
   0x4   :  { %94 = dma.done.wait [#allocation3], 256  }
   0x5   :  { %95 = vsyncadd [#allocation3], 4294967040  ;;  %s99_s11 = smov [#allocation5]   ;;  %s34_s15 = sshll.u32 %s117_s1, 4  ;;  %v23_v0 = vld [vmem:[#allocation2] sm:$0xff]  ;;  %v24_v1 = vld [vmem:[#allocation2 + $0x8] sm:$0xff]  ;;  %s35_s15 = int_to_ptr.hbm [resolvable:$true] %s34_s15 }
   0x6   :  { %s32_s12 = sshll.u32 %s99_s11, 4  ;;  %25 = vst [vmem:[#allocation5] sm:$0xff] %v23_v0  ;;  %s33_s12 = int_to_ptr.vmem [resolvable:$true] %s32_s12 }
   0x7   :  { %26 = vst [vmem:[#allocation5 + $0x8] sm:$0xff] %v24_v1 }
   0x8   :  { %37 = dma.vmem_to_hbm [thread:$0]  %s33_s12, 256, %s35_s15, [#allocation4]  }
   0x9   :  { %96 = dma.done.wait [#allocation4], 256  }
   0xa   :  { %97 = vsyncadd [#allocation4], 4294967040 }
   0xb   :  { %42 = vsyncpa [#allocation3], 1 }
   0xc   :  { %43 = vsyncpa [#allocation4], 1 }

</bundles_post_ra>
